<compile_context>
chip_gen: v6e
topology: v6e:2x2x1
jax: 0.10.0
libtpu: 0.0.40
codegen_flags: <defaults>
</compile_context>

<pallas_src>
import functools

import jax
import jax.numpy as jnp
from jax.experimental import pallas as pl
from jax.experimental.pallas import tpu as pltpu

LANE = 128
NEG_BIG = -1e30  # finite "minus infinity" for padded logit columns


def _round_up(n, m):
    return ((n + m - 1) // m) * m


def _make_actor_kernel(h_pad, a_pad, num_actions):
    def actor_kernel(x_ref, w1_ref, w2_ref, w3_ref, b_ref, o_ref):
        # x: (TB, obs_dim) bf16, weights bf16, packed bias (3, P) fp32,
        # out: (TB, num_actions) fp32
        x = x_ref[...]
        b = b_ref[...]

        # fc1 + ReLU (bf16 MXU, fp32 accumulate; elementwise in fp32)
        h1 = jnp.dot(x, w1_ref[...], preferred_element_type=jnp.float32)
        h1 = jnp.maximum(h1 + b[0:1, :h_pad], 0.0)

        # fc2 + ReLU
        h2 = jnp.dot(h1.astype(jnp.bfloat16), w2_ref[...],
                     preferred_element_type=jnp.float32)
        h2 = jnp.maximum(h2 + b[1:2, :h_pad], 0.0)

        # fc3 (padded action columns have a -1e30 bias -> exp underflows to 0)
        logits = jnp.dot(h2.astype(jnp.bfloat16), w3_ref[...],
                         preferred_element_type=jnp.float32)
        logits = logits + b[2:3, :a_pad]

        # numerically stable softmax in fp32; approx reciprocal runs on the EUP
        m = jnp.max(logits, axis=-1, keepdims=True)
        e = jnp.exp(logits - m)
        denom = jnp.sum(e, axis=-1, keepdims=True)
        inv = pl.reciprocal(denom, approx=True)

        # Only the true action columns are written back (num_actions-wide out).
        o_ref[...] = (e[:, :num_actions] * inv).astype(o_ref.dtype)

    return actor_kernel


def pack_actor_params(params):
    """One-time packing: lane-padded bf16 weights + one (3, P) fp32 bias block.

    Call once (outside the per-step path); the packed arrays are reused by
    every actor_forward call.
    """
    w1, b1 = params["w1"], params["b1"]
    w2, b2 = params["w2"], params["b2"]
    w3, b3 = params["w3"], params["b3"]

    obs_dim, hidden = w1.shape
    num_actions = w3.shape[1]
    h_pad = _round_up(hidden, LANE)
    a_pad = _round_up(num_actions, LANE)
    p = max(h_pad, a_pad)

    # Zero lane-padding is numerically exact; MXU operands cast to bf16.
    w1p = jnp.pad(w1, ((0, 0), (0, h_pad - hidden))).astype(jnp.bfloat16)
    w2p = jnp.pad(w2, ((0, h_pad - hidden), (0, h_pad - hidden))).astype(jnp.bfloat16)
    w3p = jnp.pad(w3, ((0, h_pad - hidden), (0, a_pad - num_actions))).astype(jnp.bfloat16)

    bias = jnp.zeros((3, p), jnp.float32)
    bias = bias.at[0, :hidden].set(b1.reshape(-1))
    bias = bias.at[1, :hidden].set(b2.reshape(-1))
    bias = bias.at[2, :a_pad].set(jnp.full((a_pad,), NEG_BIG, jnp.float32))
    bias = bias.at[2, :num_actions].set(b3.reshape(-1))

    return {"w1p": w1p, "w2p": w2p, "w3p": w3p, "bias": bias}


@functools.partial(jax.jit, static_argnames=("num_actions", "batch_tile"))
def actor_forward(x, w1p, w2p, w3p, bias, *, num_actions, batch_tile=1024):
    """x: (B, obs_dim) float32. Returns (B, num_actions) float32 softmax probs."""
    B, obs_dim = x.shape
    h_pad = w1p.shape[1]
    a_pad = w3p.shape[1]
    p = bias.shape[1]

    # Batch tiling: rows in multiples of 16 (bf16 sublane packing); cap the
    # tile so the grid has at least 2 steps when B > 16 (keeps both v7x
    # TensorCores busy via the "parallel" batch axis).
    tb = min(batch_tile, _round_up(B, 16))
    if B > 16:
        tb = min(tb, max(16, _round_up(pl.cdiv(B, 2), 16)))
    b_pad = _round_up(B, tb)
    grid = (b_pad // tb,)

    # Fused pad + cast of the activations (no zeros().at[].set() round trip).
    x_p = jnp.pad(x, ((0, b_pad - B), (0, 0))).astype(jnp.bfloat16)

    kernel = _make_actor_kernel(h_pad, a_pad, num_actions)

    out = pl.pallas_call(
        kernel,
        out_shape=jax.ShapeDtypeStruct((b_pad, num_actions), jnp.float32),
        grid=grid,
        in_specs=[
            # x: streamed per batch tile (double-buffered by default)
            pl.BlockSpec((tb, obs_dim), lambda i: (i, 0)),
            # weights + packed bias: grid-invariant, VMEM-resident, single buffer
            pl.BlockSpec((obs_dim, h_pad), lambda i: (0, 0),
                         pipeline_mode=pl.Buffered(1)),
            pl.BlockSpec((h_pad, h_pad), lambda i: (0, 0),
                         pipeline_mode=pl.Buffered(1)),
            pl.BlockSpec((h_pad, a_pad), lambda i: (0, 0),
                         pipeline_mode=pl.Buffered(1)),
            pl.BlockSpec((3, p), lambda i: (0, 0),
                         pipeline_mode=pl.Buffered(1)),
        ],
        # Last block dim == full array dim (num_actions), so no 128-multiple
        # requirement; only the useful columns hit HBM.
        out_specs=pl.BlockSpec((tb, num_actions), lambda i: (i, 0)),
        compiler_params=pltpu.CompilerParams(
            dimension_semantics=("parallel",),
        ),
    )(x_p, w1p, w2p, w3p, bias)

    return out if b_pad == B else out[:B]


def actor_reference(x, params):
    """Pure-JAX fp32 reference of the PyTorch forward."""
    h1 = jnp.maximum(x @ params["w1"] + params["b1"], 0.0)
    h2 = jnp.maximum(h1 @ params["w2"] + params["b2"], 0.0)
    logits = h2 @ params["w3"] + params["b3"]
    return jax.nn.softmax(logits, axis=-1)


def init_params(key, obs_dim, num_actions, hidden=64):
    """Deterministic synthetic init matching nn.Linear shapes, stored (in, out)."""
    k1, k2, k3 = jax.random.split(key, 3)

    def linear(k, fan_in, fan_out):
        bound = 1.0 / jnp.sqrt(jnp.float32(fan_in))
        kw, kb = jax.random.split(k)
        w = jax.random.uniform(kw, (fan_in, fan_out), jnp.float32, -bound, bound)
        b = jax.random.uniform(kb, (fan_out,), jnp.float32, -bound, bound)
        return w, b

    w1, b1 = linear(k1, obs_dim, hidden)
    w2, b2 = linear(k2, hidden, hidden)
    w3, b3 = linear(k3, hidden, num_actions)
    return {"w1": w1, "b1": b1, "w2": w2, "b2": b2, "w3": w3, "b3": b3}


if __name__ == "__main__":
    # Small shapes consistent with the module: obs_dim from observation_space,
    # num_actions from action_space. obs_dim=32, num_actions=8, batch=8.
    B, OBS_DIM, NUM_ACTIONS = 8, 32, 8

    key = jax.random.PRNGKey(0)
    kx, kp = jax.random.split(key)
    x = jax.random.normal(kx, (B, OBS_DIM), dtype=jnp.float32)
    params = init_params(kp, OBS_DIM, NUM_ACTIONS)

    packed = pack_actor_params(params)  # one-time weight packing (hoisted)

    out = actor_forward(x, packed["w1p"], packed["w2p"], packed["w3p"],
                        packed["bias"], num_actions=NUM_ACTIONS)
    out = jax.block_until_ready(out)

    # Sanity: shape, softmax rows sum to ~1 (approx reciprocal -> ~1e-3), and
    # close to the fp32 reference (loose atol: MXU operands are bf16).
    ref = actor_reference(x, params)
    row_sums = jnp.sum(out, axis=-1)
    assert out.shape == (B, NUM_ACTIONS)
    assert bool(jnp.all(jnp.abs(row_sums - 1.0) < 5e-3))
    assert bool(jnp.max(jnp.abs(out - ref)) < 5e-2)

    # Exercise the multi-tile batch grid (ragged tail + >=2 grid steps).
    B2 = 200
    x2 = jax.random.normal(jax.random.PRNGKey(1), (B2, OBS_DIM), dtype=jnp.float32)
    out2 = jax.block_until_ready(
        actor_forward(x2, packed["w1p"], packed["w2p"], packed["w3p"],
                      packed["bias"], num_actions=NUM_ACTIONS, batch_tile=64))
    ref2 = actor_reference(x2, params)
    assert out2.shape == (B2, NUM_ACTIONS)
    assert bool(jnp.all(jnp.abs(jnp.sum(out2, axis=-1) - 1.0) < 5e-3))
    assert bool(jnp.max(jnp.abs(out2 - ref2)) < 5e-2)

    print("KERNEL_OK")
</pallas_src>

<mosaic_0001>
module attributes {stable_mosaic.version = 11 : i64} {
  func.func @actor_kernel(%arg0: i32, %arg1: memref<16x32xbf16, #tpu.memory_space<vmem>>, %arg2: memref<32x128xbf16, #tpu.memory_space<vmem>>, %arg3: memref<128x128xbf16, #tpu.memory_space<vmem>>, %arg4: memref<128x128xbf16, #tpu.memory_space<vmem>>, %arg5: memref<3x128xf32, #tpu.memory_space<vmem>>, %arg6: memref<16x8xf32, #tpu.memory_space<vmem>>) attributes {dimension_semantics = [#tpu.dimension_semantics<parallel>], iteration_bounds = array<i64: 1>, scalar_prefetch = 0 : i64, scratch_operands = 0 : i64, tpu.core_type = #tpu.core_type<tc>, window_params = [{transform_indices = @transform_0, window_bounds = array<i64: 16, 32>}, {pipeline_mode = #tpu.pipeline_mode<synchronous>, transform_indices = @transform_1, window_bounds = array<i64: 32, 128>}, {pipeline_mode = #tpu.pipeline_mode<synchronous>, transform_indices = @transform_2, window_bounds = array<i64: 128, 128>}, {pipeline_mode = #tpu.pipeline_mode<synchronous>, transform_indices = @transform_3, window_bounds = array<i64: 128, 128>}, {pipeline_mode = #tpu.pipeline_mode<synchronous>, transform_indices = @transform_4, window_bounds = array<i64: 3, 128>}, {transform_indices = @transform_5, window_bounds = array<i64: 16, 8>}]} {
    %c0 = arith.constant 0 : index
    %c0_0 = arith.constant 0 : index
    %0 = vector.load %arg1[%c0, %c0_0] : memref<16x32xbf16, #tpu.memory_space<vmem>>, vector<16x32xbf16>
    %c0_1 = arith.constant 0 : index
    %c0_2 = arith.constant 0 : index
    %1 = vector.load %arg5[%c0_1, %c0_2] : memref<3x128xf32, #tpu.memory_space<vmem>>, vector<3x128xf32>
    %c0_3 = arith.constant 0 : index
    %c0_4 = arith.constant 0 : index
    %2 = vector.load %arg2[%c0_3, %c0_4] : memref<32x128xbf16, #tpu.memory_space<vmem>>, vector<32x128xbf16>
    %cst = arith.constant dense<0.000000e+00> : vector<16x128xf32>
    %3 = tpu.matmul %0, %2, %cst {dimension_numbers = #tpu.dot_dimension_numbers<[1], [0], [0], [1], [0, 0, 1, 1], [], []>} : vector<16x32xbf16>, vector<32x128xbf16>, vector<16x128xf32> -> vector<16x128xf32>
    %4 = vector.extract_strided_slice %1 {offsets = [0, 0], sizes = [1, 128], strides = [1, 1]} : vector<3x128xf32> to vector<1x128xf32>
    %5 = vector.broadcast %4 : vector<1x128xf32> to vector<16x128xf32>
    %6 = arith.addf %3, %5 : vector<16x128xf32>
    %cst_5 = arith.constant 0.000000e+00 : f32
    %7 = vector.broadcast %cst_5 : f32 to vector<16x128xf32>
    %8 = arith.maximumf %6, %7 : vector<16x128xf32>
    %9 = arith.truncf %8 : vector<16x128xf32> to vector<16x128xbf16>
    %c0_6 = arith.constant 0 : index
    %c0_7 = arith.constant 0 : index
    %10 = vector.load %arg3[%c0_6, %c0_7] : memref<128x128xbf16, #tpu.memory_space<vmem>>, vector<128x128xbf16>
    %cst_8 = arith.constant dense<0.000000e+00> : vector<16x128xf32>
    %11 = tpu.matmul %9, %10, %cst_8 {dimension_numbers = #tpu.dot_dimension_numbers<[1], [0], [0], [1], [0, 0, 1, 1], [], []>} : vector<16x128xbf16>, vector<128x128xbf16>, vector<16x128xf32> -> vector<16x128xf32>
    %12 = vector.extract_strided_slice %1 {offsets = [1, 0], sizes = [1, 128], strides = [1, 1]} : vector<3x128xf32> to vector<1x128xf32>
    %13 = vector.broadcast %12 : vector<1x128xf32> to vector<16x128xf32>
    %14 = arith.addf %11, %13 : vector<16x128xf32>
    %cst_9 = arith.constant 0.000000e+00 : f32
    %15 = vector.broadcast %cst_9 : f32 to vector<16x128xf32>
    %16 = arith.maximumf %14, %15 : vector<16x128xf32>
    %17 = arith.truncf %16 : vector<16x128xf32> to vector<16x128xbf16>
    %c0_10 = arith.constant 0 : index
    %c0_11 = arith.constant 0 : index
    %18 = vector.load %arg4[%c0_10, %c0_11] : memref<128x128xbf16, #tpu.memory_space<vmem>>, vector<128x128xbf16>
    %cst_12 = arith.constant dense<0.000000e+00> : vector<16x128xf32>
    %19 = tpu.matmul %17, %18, %cst_12 {dimension_numbers = #tpu.dot_dimension_numbers<[1], [0], [0], [1], [0, 0, 1, 1], [], []>} : vector<16x128xbf16>, vector<128x128xbf16>, vector<16x128xf32> -> vector<16x128xf32>
    %20 = vector.extract_strided_slice %1 {offsets = [2, 0], sizes = [1, 128], strides = [1, 1]} : vector<3x128xf32> to vector<1x128xf32>
    %21 = vector.broadcast %20 : vector<1x128xf32> to vector<16x128xf32>
    %22 = arith.addf %19, %21 : vector<16x128xf32>
    %cst_13 = arith.constant dense<0xFF800000> : vector<16xf32>
    %23 = vector.multi_reduction <maximumf>, %22, %cst_13 [1] : vector<16x128xf32> to vector<16xf32>
    %24 = vector.shape_cast %23 : vector<16xf32> to vector<16x1xf32>
    %25 = vector.broadcast %24 : vector<16x1xf32> to vector<16x128xf32>
    %26 = arith.subf %22, %25 : vector<16x128xf32>
    %27 = math.exp %26 : vector<16x128xf32>
    %cst_14 = arith.constant dense<0.000000e+00> : vector<16xf32>
    %28 = vector.multi_reduction <add>, %27, %cst_14 [1] : vector<16x128xf32> to vector<16xf32>
    %29 = vector.shape_cast %28 : vector<16xf32> to vector<16x1xf32>
    %30 = tpu.reciprocal %29 {approx = true} : vector<16x1xf32> -> vector<16x1xf32>
    %31 = vector.extract_strided_slice %27 {offsets = [0, 0], sizes = [16, 8], strides = [1, 1]} : vector<16x128xf32> to vector<16x8xf32>
    %32 = vector.broadcast %30 : vector<16x1xf32> to vector<16x8xf32>
    %33 = arith.mulf %31, %32 : vector<16x8xf32>
    %c0_15 = arith.constant 0 : index
    %c0_16 = arith.constant 0 : index
    %34 = vector.load %arg6[%c0_15, %c0_16] : memref<16x8xf32, #tpu.memory_space<vmem>>, vector<16x8xf32>
    tpu.vector_store %arg6[%c0_15, %c0_16], %33 {strides = array<i32>} : memref<16x8xf32, #tpu.memory_space<vmem>>, vector<16x8xf32>,
    return
  }
  func.func @transform_0(%arg0: i32) -> (i32, i32) {
    %c0_i32 = arith.constant 0 : i32
    %c0_i32_0 = arith.constant 0 : i32
    return %arg0, %c0_i32 : i32, i32
  }
  func.func @transform_1(%arg0: i32) -> (i32, i32) {
    %c0_i32 = arith.constant 0 : i32
    %c0_i32_0 = arith.constant 0 : i32
    %c0_i32_1 = arith.constant 0 : i32
    return %c0_i32, %c0_i32_0 : i32, i32
  }
  func.func @transform_2(%arg0: i32) -> (i32, i32) {
    %c0_i32 = arith.constant 0 : i32
    %c0_i32_0 = arith.constant 0 : i32
    %c0_i32_1 = arith.constant 0 : i32
    return %c0_i32, %c0_i32_0 : i32, i32
  }
  func.func @transform_3(%arg0: i32) -> (i32, i32) {
    %c0_i32 = arith.constant 0 : i32
    %c0_i32_0 = arith.constant 0 : i32
    %c0_i32_1 = arith.constant 0 : i32
    return %c0_i32, %c0_i32_0 : i32, i32
  }
  func.func @transform_4(%arg0: i32) -> (i32, i32) {
    %c0_i32 = arith.constant 0 : i32
    %c0_i32_0 = arith.constant 0 : i32
    %c0_i32_1 = arith.constant 0 : i32
    return %c0_i32, %c0_i32_0 : i32, i32
  }
  func.func @transform_5(%arg0: i32) -> (i32, i32) {
    %c0_i32 = arith.constant 0 : i32
    %c0_i32_0 = arith.constant 0 : i32
    return %arg0, %c0_i32 : i32, i32
  }
}

</mosaic_0001>

<bundles_post_ra>
// kernel: actor_forward.1
= control target key start
LH: loop header
LB: loop body
LE: loop exit
PB: predicated region body
PF: predicated region fallthrough
CT: control target
= control target key end

     0   :  { %10 = vsyncpa [#allocation3], 0  ;;  %s623_s0 = inlined_call_operand.vmem [shape: bf16[16,32], index: 0, kind: input, shape index: {}]   ;;  %s624_s1 = inlined_call_operand.vmem [shape: bf16[32,128], index: 1, kind: input, shape index: {}]   ;;  %s625_s2 = inlined_call_operand.hbm [shape: bf16[128,128], index: 2, kind: input, shape index: {}]   ;;  %s626_s3 = inlined_call_operand.hbm [shape: bf16[128,128], index: 3, kind: input, shape index: {}]   ;;  %s627_s4 = inlined_call_operand.vmem [shape: f32[3,128], index: 4, kind: input, shape index: {}]   ;;  %s628_s5 = inlined_call_operand.vmem [shape: f32[16,8], index: 5, kind: output, shape index: {}]  }
   0x1   :  { %11 = vsyncpa [#allocation5], 0  ;;  %s539_s18 = smov [#allocation2]  }
   0x2   :  { %s21_s19 = sshll.u32 %s539_s18, 4  ;;  %s22_s19 = int_to_ptr.vmem [resolvable:$true] %s21_s19 }
   0x3   :  { %s503_s20 = scalar_lea.vmem %s22_s19, 1024  ;;  %p508_p1 = scmp.lt.s32.totalorder %s22_s19, %s22_s19 }
   0x4   :  { %p504_p0 = scmp.ne.s32.totalorder %s22_s19, %s503_s20  ;;  %p509_p2 = scmp.lt.s32.totalorder %s503_s20, %s503_s20 }
   0x6   :  { %p510_p3 = por %p509_p2, %p508_p1 }
   0x8   :  { %p511_p4 = pnand %p510_p3, %p504_p0 }
   0xa   :  { %514 = shalt.err (!%p511_p4)
}
   0xb   :  { %s540_s21 = smov 64   ;;  %s541_s22 = smov 4  }
   0xc   :  { %27 = dma.hbm_to_vmem [thread:$0]  %s625_s2, 1024, %s22_s19, [#allocation3], %s540_s21, %s540_s21, %s541_s22  }
   0xd   :  { %s542_s25 = smov [#allocation4]  }
   0xe   :  { %s33_s26 = sshll.u32 %s542_s25, 4  ;;  %s34_s26 = int_to_ptr.vmem [resolvable:$true] %s33_s26 }
   0xf   :  { %s523_s27 = scalar_lea.vmem %s34_s26, 1024  ;;  %p528_p6 = scmp.lt.s32.totalorder %s34_s26, %s34_s26 }
  0x10   :  { %p524_p5 = scmp.ne.s32.totalorder %s34_s26, %s523_s27  ;;  %p529_p7 = scmp.lt.s32.totalorder %s523_s27, %s523_s27 }
  0x12   :  { %p530_p8 = por %p529_p7, %p528_p6 }
  0x14   :  { %p531_p9 = pnand %p530_p8, %p524_p5 }
  0x16   :  { %534 = shalt.err (!%p531_p9)
}
  0x17   :  { %39 = dma.hbm_to_vmem [thread:$0]  %s626_s3, 1024, %s34_s26, [#allocation5], %s540_s21, %s540_s21, %s541_s22  }
  0x18   :  { %535 = dma.done.wait [#allocation3], 1024  }
  0x19   :  { %536 = vsyncadd [#allocation3], 4294966272 }
  0x1a   :  { %537 = dma.done.wait [#allocation5], 1024  }
  0x1b   :  { %538 = vsyncadd [#allocation5], 4294966272  ;;  %v543_v0 = vmov 0.0   ;;  %vm544_vm0 = vmmov 0   ;;  %v468_v1 = vld [vmem:[%s624_s1 + $0x8] sm:$0xff]   ;;  %v469_v2 = vld [vmem:[%s624_s1] sm:$0xff]   ;;  %v56_v17 = vlaneseq }
  0x1c   :  { %414 = vmatprep.subr.bf16.mxu0 %v543_v0  ;;  %418 = vmatprep.mubr.msk.bf16.mxu0 %vm544_vm0, %v543_v0  ;;  %v471_v3 = vld [vmem:[#allocation2 + $0x38] sm:$0xff]   ;;  %v470_v4 = vld [vmem:[%s623_s0] sm:$0xff]   ;;  %v472_v5 = vld [vmem:[#allocation2 + $0x30] sm:$0xff]   ;;  %vm77_vm1 = vcmask 261120   ;;  %vm364_vm2 = vcmask 64512  }
  0x1d   :  { %422 = vmatprep.subr.bf16.mxu1 %v543_v0  ;;  %438 = vmatprep.mubr.msk.bf16.mxu1 %vm544_vm0, %v543_v0  ;;  %v473_v6 = vld [vmem:[#allocation2 + $0x28] sm:$0xff]   ;;  %v474_v7 = vld [vmem:[#allocation2 + $0x20] sm:$0xff]   ;;  %v475_v8 = vld [vmem:[#allocation2 + $0x18] sm:$0xff]   ;;  %v57_v18 = vshrl.u32 %v56_v17, 7 }
  0x1e   :  { %415 = vmatpush3.bf16.msra.mxu0 %v468_v1  ;;  %423 = vmatpush3.bf16.msra.mxu1 %v471_v3  ;;  %v476_v9 = vld [vmem:[#allocation2 + $0x10] sm:$0xff]   ;;  %v477_v10 = vld [vmem:[#allocation2 + $0x8] sm:$0xff]   ;;  %v478_v11 = vld [vmem:[#allocation2] sm:$0xff]  }
  0x1f   :  { %416 = vmatprep.subr.bf16.mxu0 %v543_v0  ;;  %424 = vmatprep.subr.bf16.mxu1 %v543_v0  ;;  %v479_v12 = vld [vmem:[#allocation4 + $0x38] sm:$0xff]   ;;  %v480_v13 = vld [vmem:[#allocation4 + $0x30] sm:$0xff]   ;;  %v481_v14 = vld [vmem:[#allocation4 + $0x28] sm:$0xff]   ;;  %v58_v19 = vsub.s32 0, %v57_v18  ;;  %v143_v34 = vsub.s32 1, %v57_v18  ;;  %v255_v45 = vsub.s32 2, %v57_v18 }
  0x20   :  { %v482_v15 = vld [vmem:[#allocation4 + $0x20] sm:$0xff]   ;;  %v483_v16 = vld [vmem:[#allocation4 + $0x18] sm:$0xff]   ;;  %v484_v31 = vld [vmem:[#allocation4 + $0x10] sm:$0xff]  }
  0x21   :  { %v51_v20 = vld [vmem:[%s627_s4] sm:$0x7]  ;;  %v485_v32 = vld [vmem:[#allocation4 + $0x8] sm:$0xff]  }
  0x22   :  { %417 = vmatpush3.bf16.msra.mxu0 %v469_v2  ;;  %425 = vmatpush3.bf16.msra.mxu1 %v472_v5  ;;  %v59_v21 = vrot.slane %v51_v20, %v58_v19  ;;  %v486_v33 = vld [vmem:[#allocation4] sm:$0xff]   ;;  %v144_v35 = vrot.slane %v51_v20, %v143_v34  ;;  %v256_v46 = vrot.slane %v51_v20, %v255_v45 }
  0x23   :  { %442 = vmatprep.subr.bf16.mxu0 %v543_v0  ;;  %426 = vmatprep.subr.bf16.mxu1 %v543_v0 }
  0x25   :  { %419 = vmatmul.mubr.msk.bf16.vlgmr.msra.gmra.mxu0 %vm77_vm1, %v470_v4 }
  0x26   :  { %458 = vmatprep.mubr.msk.bf16.mxu0 %vm544_vm0, %v543_v0  ;;  %427 = vmatpush3.bf16.msra.mxu1 %v473_v6 }
  0x27   :  { %428 = vmatprep.subr.bf16.mxu1 %v543_v0  ;;  %443 = vmatpush3.bf16.msra.mxu0 %v479_v12 }
  0x28   :  { %444 = vmatprep.subr.bf16.mxu0 %v543_v0 }
  0x2a   :  { %429 = vmatpush3.bf16.msra.mxu1 %v474_v7 }
  0x2b   :  { %430 = vmatprep.subr.bf16.mxu1 %v543_v0  ;;  %445 = vmatpush3.bf16.msra.mxu0 %v480_v13 }
  0x2c   :  { %446 = vmatprep.subr.bf16.mxu0 %v543_v0 }
  0x2e   :  { %431 = vmatpush3.bf16.msra.mxu1 %v475_v8 }
  0x2f   :  { %432 = vmatprep.subr.bf16.mxu1 %v543_v0  ;;  %447 = vmatpush3.bf16.msra.mxu0 %v481_v14 }
  0x30   :  { %448 = vmatprep.subr.bf16.mxu0 %v543_v0 }
  0x32   :  { %433 = vmatpush3.bf16.msra.mxu1 %v476_v9 }
  0x33   :  { %434 = vmatprep.subr.bf16.mxu1 %v543_v0  ;;  %449 = vmatpush3.bf16.msra.mxu0 %v482_v15 }
  0x34   :  { %450 = vmatprep.subr.bf16.mxu0 %v543_v0 }
  0x36   :  { %435 = vmatpush3.bf16.msra.mxu1 %v477_v10 }
  0x37   :  { %436 = vmatprep.subr.bf16.mxu1 %v543_v0  ;;  %451 = vmatpush3.bf16.msra.mxu0 %v483_v16 }
  0x38   :  { %452 = vmatprep.subr.bf16.mxu0 %v543_v0 }
  0x3a   :  { %437 = vmatpush3.bf16.msra.mxu1 %v478_v11 }
  0x3b   :  { %453 = vmatpush3.bf16.msra.mxu0 %v484_v31 }
  0x3c   :  { %454 = vmatprep.subr.bf16.mxu0 %v543_v0 }
  0x3f   :  { %455 = vmatpush3.bf16.msra.mxu0 %v485_v32 }
  0x40   :  { %456 = vmatprep.subr.bf16.mxu0 %v543_v0 }
  0x43   :  { %457 = vmatpush3.bf16.msra.mxu0 %v486_v33 }
  0xe5   :  { %v115_v22 = vpop.f32.mrf.mxu0 }
  0xe6   :  { %v116_v24 = vadd.f32 %v115_v22, %v59_v21 }
  0xe7   :  { %v420_v23 = vpop.f32.mrf.mxu0 }
  0xe8   :  { %v122_v28 = vmax.f32 %v116_v24, 0.0 }
  0xe9   :  { %v118_v25 = vpop.f32.mrf.mxu0 }
  0xea   :  { %v119_v26 = vadd.f32 %v118_v25, %v59_v21 }
  0xeb   :  { %v421_v27 = vpop.f32.mrf.mxu0 }
  0xec   :  { %v123_v29 = vmax.f32 %v119_v26, 0.0 }
  0xee   :  { %v124_v30 = vpack.c.bf16 %v123_v29, %v122_v28 }
  0xf0   :  { %439 = vmatmul.mubr.bf16.vlgmr.msra.gmra.mxu1 %v124_v30 }
 0x1b0   :  { %v227_v36 = vpop.f32.mrf.mxu1 }
 0x1b1   :  { %v228_v38 = vadd.f32 %v227_v36, %v144_v35 }
 0x1b2   :  { %v440_v37 = vpop.f32.mrf.mxu1 }
 0x1b3   :  { %v234_v42 = vmax.f32 %v228_v38, 0.0 }
 0x1b4   :  { %v230_v39 = vpop.f32.mrf.mxu1 }
 0x1b5   :  { %v231_v40 = vadd.f32 %v230_v39, %v144_v35 }
 0x1b6   :  { %v441_v41 = vpop.f32.mrf.mxu1 }
 0x1b7   :  { %v235_v43 = vmax.f32 %v231_v40, 0.0 }
 0x1b9   :  { %v236_v44 = vpack.c.bf16 %v235_v43, %v234_v42 }
 0x1bb   :  { %459 = vmatmul.mubr.bf16.vlgmr.msra.gmra.mxu0 %v236_v44 }
 0x27b   :  { %v339_v47 = vpop.f32.mrf.mxu0 }
 0x27c   :  { %v340_v48 = vadd.f32 %v339_v47, %v256_v46 }
 0x27d   :  { %v460_v49 = vpop.f32.mrf.mxu0 }
 0x27e   :  { %346 = vmax.xlane.f32.xlu0 %v340_v48 }
 0x27f   :  { %v342_v50 = vpop.f32.mrf.mxu0 }
 0x280   :  { %v343_v51 = vadd.f32 %v342_v50, %v256_v46 }
 0x281   :  { %v461_v52 = vpop.f32.mrf.mxu0 }
 0x282   :  { %348 = vmax.xlane.f32.xlu0 %v343_v51 }
 0x307   :  { %v347_v53 = vpop.xlane.xlu0 %346 }
 0x308   :  { %v350_v54 = vsub.f32 %v340_v48, %v347_v53 }
 0x30a   :  { %v352_v55 = vmul.f32 1.442695, %v350_v54 }
 0x30b   :  { %v349_v56 = vpop.xlane.xlu0 %348 }
 0x30c   :  { %487 = vpow2.f32 %v352_v55  ;;  %v351_v57 = vsub.f32 %v343_v51, %v349_v56 }
 0x30e   :  { %v354_v58 = vmul.f32 1.442695, %v351_v57 }
 0x310   :  { %489 = vpow2.f32 %v354_v58 }
 0x319   :  { %v488_v59 = vpop.eup %487 }
 0x31a   :  { %356 = vadd.xlane.f32.xlu1 %v488_v59 }
 0x31d   :  { %v490_v60 = vpop.eup %489 }
 0x31e   :  { %358 = vadd.xlane.f32.xlu1 %v490_v60 }
 0x3a3   :  { %v357_v61 = vpop.xlane.xlu1 %356 }
 0x3a4   :  { %491 = vrcp.f32 %v357_v61 }
 0x3a7   :  { %v359_v62 = vpop.xlane.xlu1 %358 }
 0x3a8   :  { %493 = vrcp.f32 %v359_v62 }
 0x3b1   :  { %v492_v63 = vpop.eup %491 }
 0x3b2   :  { %v362_v0 = vmul.f32 %v492_v63, %v488_v59 }
 0x3b4   :  { %365 = vst.msk [vmem:[%s628_s5] sm:$0xff] %vm364_vm2, %v362_v0 }
 0x3b5   :  { %v494_v1 = vpop.eup %493 }
 0x3b6   :  { %v363_v2 = vmul.f32 %v494_v1, %v490_v60 }
 0x3b8   :  { %366 = vst.msk [vmem:[%s628_s5 + $0x8] sm:$0xff] %vm364_vm2, %v363_v2 }
 0x3b9   :  { %371 = vsyncpa [#allocation3], 1 }
 0x3ba   :  { %372 = vsyncpa [#allocation5], 1 }

</bundles_post_ra>
